<compile_context>
chip_gen: v6e
topology: v6e:2x2x1
jax: 0.10.0
libtpu: 0.0.40
codegen_flags: <defaults>
</compile_context>

<pallas_src>
import functools
import math

import jax
import jax.numpy as jnp
import numpy as np
from jax.experimental import pallas as pl
from jax.experimental.pallas import tpu as pltpu


# ----------------------------------------------------------------------------
# tiling helpers
# ----------------------------------------------------------------------------
def _round_up(x, m):
    return (x + m - 1) // m * m


def _pick_row_tile(M, K, ncols):
    """Row tile for the fused matmul.

    >=2 grid steps when possible (v7x has 2 TensorCores; grid axis is 'parallel'),
    512-row tiles for large M (v6e sweet spot), and a VMEM guard so double-buffered
    tiles stay well inside the 32 MiB scoped-VMEM default (v7x has 64 MiB physical).
    """
    Mp = _round_up(M, 16)                         # bf16 sublane packing
    if Mp <= 32:
        return Mp, Mp
    tm = _round_up((Mp + 1) // 2, 16) if Mp <= 1024 else 512
    # bytes/step ~ 2 double-buffered bf16 x tiles + resident bf16 weights + 2 f32 outs
    while tm > 64 and (4 * tm * K + 2 * K * ncols + 8 * tm * ncols) > (24 << 20):
        tm //= 2
    return tm, _round_up(Mp, tm)


def _edge_tiling(E):
    """Lane-dense edge tile te and padded extent Ep (always a multiple of te).

    Big tiles amortize the ~0.35us/step pipeline overhead (128..2048 tiles are
    step-overhead bound); >=2 grid steps keep both v7x TensorCores busy.
    """
    Emin = _round_up(max(E, 128), 128)
    if Emin == 128:
        return 128, 128
    te = min(16384, _round_up((Emin + 1) // 2, 128))
    return te, _round_up(Emin, te)


# ----------------------------------------------------------------------------
# Pallas kernels
# ----------------------------------------------------------------------------
def _fused_matmul_kernel(x_ref, w_ref, wsc_ref, wx_ref, sc_ref):
    # x: [tm, K] bf16, w: [K, A] bf16, wsc: [K, 2H] bf16 -> f32 outputs.
    x = x_ref[...]
    wx_ref[...] = jnp.dot(x, w_ref[...], preferred_element_type=jnp.float32)
    sc_ref[...] = jnp.dot(x, wsc_ref[...], preferred_element_type=jnp.float32)


def _edge_num_kernel(gsrc_ref, gdst_ref, c_ref, num_ref, *, alpha):
    # num = exp(LeakyReLU(s1[src] + s2[dst]) - c), fused in one pass.
    # gsrc/gdst: [H, te]; c: [H, 1] per-head stabilization constant.
    # Note: H (=heads) occupies only H of 8 f32 sublanes; acceptable since these
    # passes are HBM-bound, full lane density is what matters here.
    e = gsrc_ref[...] + gdst_ref[...]
    e = jnp.where(e >= 0, e, alpha * e)
    num_ref[...] = jnp.exp(e - c_ref[...])


def _edge_norm_kernel(num_ref, sg_ref, att_ref):
    # att = num / (segment_sum[idx] + eps), reciprocal on the EUP slot.
    att_ref[...] = num_ref[...] * pl.reciprocal(sg_ref[...] + 1e-16, approx=True)


# ----------------------------------------------------------------------------
# Pallas wrappers
# ----------------------------------------------------------------------------
def pallas_fused_matmul(x_bf16, w_bf16, wsc_bf16):
    """wx = x @ W and scores = x @ [W@B1 | W@B2] in one MXU pass over row tiles."""
    M, K = x_bf16.shape
    A = w_bf16.shape[1]
    S2 = wsc_bf16.shape[1]
    tm, Mp = _pick_row_tile(M, K, A + S2)
    xp = x_bf16 if Mp == M else jnp.pad(x_bf16, ((0, Mp - M), (0, 0)))
    wx, sc = pl.pallas_call(
        _fused_matmul_kernel,
        out_shape=(jax.ShapeDtypeStruct((Mp, A), jnp.float32),
                   jax.ShapeDtypeStruct((Mp, S2), jnp.float32)),
        grid_spec=pltpu.PrefetchScalarGridSpec(
            num_scalar_prefetch=0,
            grid=(Mp // tm,),
            in_specs=[
                pl.BlockSpec((tm, K), lambda i: (i, 0)),
                pl.BlockSpec((K, A), lambda i: (0, 0)),
                pl.BlockSpec((K, S2), lambda i: (0, 0)),
            ],
            out_specs=[
                pl.BlockSpec((tm, A), lambda i: (i, 0)),
                pl.BlockSpec((tm, S2), lambda i: (i, 0)),
            ],
        ),
        compiler_params=pltpu.CompilerParams(
            dimension_semantics=("parallel",)),
    )(xp, w_bf16, wsc_bf16)
    if Mp != M:
        wx, sc = wx[:M], sc[:M]
    return wx, sc


def pallas_edge_num(g_src, g_dst, c, *, alpha, te):
    """num = exp(LeakyReLU(g_src + g_dst) - c) on lane-dense [H, Ep] tiles."""
    H, Ep = g_src.shape
    return pl.pallas_call(
        functools.partial(_edge_num_kernel, alpha=alpha),
        out_shape=jax.ShapeDtypeStruct((H, Ep), jnp.float32),
        grid_spec=pltpu.PrefetchScalarGridSpec(
            num_scalar_prefetch=0,
            grid=(Ep // te,),
            in_specs=[
                pl.BlockSpec((H, te), lambda i: (0, i)),
                pl.BlockSpec((H, te), lambda i: (0, i)),
                pl.BlockSpec((H, 1), lambda i: (0, 0)),
            ],
            out_specs=pl.BlockSpec((H, te), lambda i: (0, i)),
        ),
        compiler_params=pltpu.CompilerParams(
            dimension_semantics=("parallel",)),
    )(g_src, g_dst, c)


def pallas_edge_norm(num, sg, *, te):
    """att = num * reciprocal(sg + eps) on lane-dense [H, Ep] tiles."""
    H, Ep = num.shape
    return pl.pallas_call(
        _edge_norm_kernel,
        out_shape=jax.ShapeDtypeStruct((H, Ep), jnp.float32),
        grid_spec=pltpu.PrefetchScalarGridSpec(
            num_scalar_prefetch=0,
            grid=(Ep // te,),
            in_specs=[
                pl.BlockSpec((H, te), lambda i: (0, i)),
                pl.BlockSpec((H, te), lambda i: (0, i)),
            ],
            out_specs=pl.BlockSpec((H, te), lambda i: (0, i)),
        ),
        compiler_params=pltpu.CompilerParams(
            dimension_semantics=("parallel",)),
    )(num, sg)


# ----------------------------------------------------------------------------
# Module (parameters + forward orchestration)
# ----------------------------------------------------------------------------
def _xavier_normal(key, shape, gain):
    # mirrors torch.nn.init.xavier_normal_ fan computation
    if len(shape) == 2:
        fan_in, fan_out = shape[0], shape[1]
    else:
        receptive = int(np.prod(shape[2:])) if len(shape) > 2 else 1
        fan_in = shape[1] * receptive
        fan_out = shape[0] * receptive
    std = gain * math.sqrt(2.0 / (fan_in + fan_out))
    return std * jax.random.normal(key, shape, dtype=jnp.float32)


class SpGraphAttentionLayer:
    def __init__(self, in_features, out_features, opt, key, concat=True):
        self.in_features = in_features
        self.out_features = out_features
        self.alpha = opt['leaky_relu_slope']
        self.concat = concat
        self.opt = opt
        self.h = opt['heads']
        self.attention_dim = opt.get('attention_dim', out_features)
        assert self.attention_dim % self.h == 0
        self.d_k = self.attention_dim // self.h

        k1, k2, k3 = jax.random.split(key, 3)
        gain = 1.414
        self.W = _xavier_normal(k1, (in_features, self.attention_dim), gain)
        self.Wout = _xavier_normal(k2, (self.attention_dim, in_features), gain)  # unused in fwd
        self.a = _xavier_normal(k3, (2 * self.d_k, 1, 1), gain)

        # Fold a1/a2 into the matmul:  s1 = wx @ B1, s2 = wx @ B2 with
        # B1[head*d_k + j, head] = a1[j] (block-diagonal), B2 likewise.
        a1 = self.a[:self.d_k].reshape(self.d_k)
        a2 = self.a[self.d_k:].reshape(self.d_k)
        eye_h = jnp.eye(self.h, dtype=jnp.float32)
        B1 = (eye_h[:, None, :] * a1[None, :, None]).reshape(self.attention_dim, self.h)
        B2 = (eye_h[:, None, :] * a2[None, :, None]).reshape(self.attention_dim, self.h)
        # bf16 MXU inputs (f32 accumulation in the kernel); precomputed once.
        self.W_bf16 = self.W.astype(jnp.bfloat16)
        self.Wsc_bf16 = jnp.concatenate([self.W @ B1, self.W @ B2],
                                        axis=1).astype(jnp.bfloat16)

    def forward(self, x, edge):
        N = x.shape[0]
        E = edge.shape[1]
        H = self.h

        # 1) one fused MXU pass: wx [N, A] and per-node scores [s1|s2] [N, 2H]
        wx, scores = pallas_fused_matmul(x.astype(jnp.bfloat16),
                                         self.W_bf16, self.Wsc_bf16)
        sT = scores.T                                   # node-sized relayout (cheap)
        s1T, s2T = sT[:H], sT[H:]                       # [H, N] each

        # Per-head softmax-invariant stabilization constant (upper-bounds every edge
        # logit since LeakyReLU is monotone).  Replacing the per-segment max with it
        # removes the segment_max scatter, its gather, and one full edge pass while
        # producing the same attention weights (softmax shift invariance).
        cmax = jnp.max(s1T, axis=1) + jnp.max(s2T, axis=1)
        c = jnp.where(cmax >= 0, cmax, self.alpha * cmax).reshape(H, 1)

        # 2) lane-dense edge tiling / padding
        te, Ep = _edge_tiling(E)
        pad = Ep - E
        src = jnp.pad(edge[0], (0, pad))                              # pad -> node 0 (dropped later)
        dst = jnp.pad(edge[1], (0, pad))
        idx = jnp.pad(edge[self.opt['attention_norm_idx']], (0, pad),
                      constant_values=N)                              # pad -> dummy segment N

        # TODO(synk): fold these XLA gathers (and the segment-sum scatter below) into
        # the Pallas edge kernels by keeping s1T/s2T VMEM-resident and sorting edges by
        # `idx` with per-node offsets passed via PrefetchScalarGridSpec scalar prefetch.
        g_src = jnp.take(s1T, src, axis=1)              # [H, Ep]
        g_dst = jnp.take(s2T, dst, axis=1)              # [H, Ep]

        # 3) fused per-edge logits + LeakyReLU + exp (single Pallas pass)
        num = pallas_edge_num(g_src, g_dst, c, alpha=self.alpha, te=te)   # [H, Ep]

        # 4) per-head segment sum (data-dependent scatter, stays in XLA; vmapped over
        #    heads so no edge-sized transposes).  Dummy segment N absorbs padded edges.
        seg_sum = jax.vmap(
            lambda v: jax.ops.segment_sum(v, idx, num_segments=N + 1))(num)  # [H, N+1]
        sg = jnp.take(seg_sum, idx, axis=1)             # [H, Ep]

        # 5) normalization (Pallas, EUP reciprocal)
        att = pallas_edge_norm(num, sg, te=te)          # [H, Ep]

        attention = att[:, :E].T                        # [E, H] (module output contract)
        return attention, wx


# ----------------------------------------------------------------------------
# Reference (pure f32 JAX) mirroring the PyTorch module exactly
# ----------------------------------------------------------------------------
def reference_forward(layer, x, edge):
    N = x.shape[0]
    wx = jnp.dot(x, layer.W, preferred_element_type=jnp.float32)
    h = wx.reshape(N, layer.h, layer.d_k).transpose(0, 2, 1)
    edge_h = jnp.concatenate((h[edge[0]], h[edge[1]]), axis=1).transpose(1, 0, 2)
    e = jnp.sum(layer.a * edge_h, axis=0)
    e = jnp.where(e >= 0, e, layer.alpha * e)
    idx = edge[layer.opt['attention_norm_idx']]
    m = jax.ops.segment_max(e, idx, num_segments=N)
    m = jnp.where(jnp.isfinite(m), m, 0.0)
    num = jnp.exp(e - m[idx])
    s = jax.ops.segment_sum(num, idx, num_segments=N)
    return num / (s[idx] + 1e-16), wx


if __name__ == "__main__":
    key = jax.random.PRNGKey(0)
    k_param, k_x, k_e0, k_e1 = jax.random.split(key, 4)

    N = 64            # number of graph nodes
    E = 256           # number of edges
    in_features = 16
    out_features = 16
    opt = {
        'leaky_relu_slope': 0.2,
        'heads': 4,
        'attention_dim': 32,
        'attention_norm_idx': 0,
    }

    layer = SpGraphAttentionLayer(in_features, out_features, opt, k_param)

    x = jax.random.normal(k_x, (N, in_features), dtype=jnp.float32)
    edge = jnp.stack([
        jax.random.randint(k_e0, (E,), 0, N, dtype=jnp.int32),
        jax.random.randint(k_e1, (E,), 0, N, dtype=jnp.int32),
    ], axis=0)

    attention, wx = layer.forward(x, edge)
    jax.block_until_ready((attention, wx))

    # Tolerances account for bf16 MXU inputs (f32 accumulation) vs. the f32 reference.
    att_ref, wx_ref = reference_forward(layer, x, edge)
    np.testing.assert_allclose(np.asarray(wx), np.asarray(wx_ref), rtol=2e-2, atol=2e-2)
    np.testing.assert_allclose(np.asarray(attention), np.asarray(att_ref), rtol=2e-2, atol=2e-2)

    print("KERNEL_OK")
</pallas_src>

<mosaic_0001>
module attributes {stable_mosaic.version = 11 : i64} {
  func.func @_fused_matmul_kernel(%arg0: i32, %arg1: memref<32x16xbf16, #tpu.memory_space<vmem>>, %arg2: memref<16x32xbf16, #tpu.memory_space<vmem>>, %arg3: memref<16x8xbf16, #tpu.memory_space<vmem>>, %arg4: memref<32x32xf32, #tpu.memory_space<vmem>>, %arg5: memref<32x8xf32, #tpu.memory_space<vmem>>) attributes {dimension_semantics = [#tpu.dimension_semantics<parallel>], iteration_bounds = array<i64: 2>, scalar_prefetch = 0 : i64, scratch_operands = 0 : i64, tpu.core_type = #tpu.core_type<tc>, window_params = [{transform_indices = @transform_0, window_bounds = array<i64: 32, 16>}, {pipeline_mode = #tpu.pipeline_mode<synchronous>, transform_indices = @transform_1, window_bounds = array<i64: 16, 32>}, {pipeline_mode = #tpu.pipeline_mode<synchronous>, transform_indices = @transform_2, window_bounds = array<i64: 16, 8>}, {transform_indices = @transform_3, window_bounds = array<i64: 32, 32>}, {transform_indices = @transform_4, window_bounds = array<i64: 32, 8>}]} {
    %c0 = arith.constant 0 : index
    %c0_0 = arith.constant 0 : index
    %0 = vector.load %arg1[%c0, %c0_0] : memref<32x16xbf16, #tpu.memory_space<vmem>>, vector<32x16xbf16>
    %c0_1 = arith.constant 0 : index
    %c0_2 = arith.constant 0 : index
    %1 = vector.load %arg2[%c0_1, %c0_2] : memref<16x32xbf16, #tpu.memory_space<vmem>>, vector<16x32xbf16>
    %cst = arith.constant dense<0.000000e+00> : vector<32x32xf32>
    %2 = tpu.matmul %0, %1, %cst {dimension_numbers = #tpu.dot_dimension_numbers<[1], [0], [0], [1], [0, 0, 1, 1], [], []>} : vector<32x16xbf16>, vector<16x32xbf16>, vector<32x32xf32> -> vector<32x32xf32>
    %c0_3 = arith.constant 0 : index
    %c0_4 = arith.constant 0 : index
    %3 = vector.load %arg4[%c0_3, %c0_4] : memref<32x32xf32, #tpu.memory_space<vmem>>, vector<32x32xf32>
    tpu.vector_store %arg4[%c0_3, %c0_4], %2 {strides = array<i32>} : memref<32x32xf32, #tpu.memory_space<vmem>>, vector<32x32xf32>,
    %c0_5 = arith.constant 0 : index
    %c0_6 = arith.constant 0 : index
    %4 = vector.load %arg3[%c0_5, %c0_6] : memref<16x8xbf16, #tpu.memory_space<vmem>>, vector<16x8xbf16>
    %cst_7 = arith.constant dense<0.000000e+00> : vector<32x8xf32>
    %5 = tpu.matmul %0, %4, %cst_7 {dimension_numbers = #tpu.dot_dimension_numbers<[1], [0], [0], [1], [0, 0, 1, 1], [], []>} : vector<32x16xbf16>, vector<16x8xbf16>, vector<32x8xf32> -> vector<32x8xf32>
    %c0_8 = arith.constant 0 : index
    %c0_9 = arith.constant 0 : index
    %6 = vector.load %arg5[%c0_8, %c0_9] : memref<32x8xf32, #tpu.memory_space<vmem>>, vector<32x8xf32>
    tpu.vector_store %arg5[%c0_8, %c0_9], %5 {strides = array<i32>} : memref<32x8xf32, #tpu.memory_space<vmem>>, vector<32x8xf32>,
    return
  }
  func.func @transform_0(%arg0: i32) -> (i32, i32) {
    %c0_i32 = arith.constant 0 : i32
    %c0_i32_0 = arith.constant 0 : i32
    return %arg0, %c0_i32 : i32, i32
  }
  func.func @transform_1(%arg0: i32) -> (i32, i32) {
    %c0_i32 = arith.constant 0 : i32
    %c0_i32_0 = arith.constant 0 : i32
    %c0_i32_1 = arith.constant 0 : i32
    return %c0_i32, %c0_i32_0 : i32, i32
  }
  func.func @transform_2(%arg0: i32) -> (i32, i32) {
    %c0_i32 = arith.constant 0 : i32
    %c0_i32_0 = arith.constant 0 : i32
    %c0_i32_1 = arith.constant 0 : i32
    return %c0_i32, %c0_i32_0 : i32, i32
  }
  func.func @transform_3(%arg0: i32) -> (i32, i32) {
    %c0_i32 = arith.constant 0 : i32
    %c0_i32_0 = arith.constant 0 : i32
    return %arg0, %c0_i32 : i32, i32
  }
  func.func @transform_4(%arg0: i32) -> (i32, i32) {
    %c0_i32 = arith.constant 0 : i32
    %c0_i32_0 = arith.constant 0 : i32
    return %arg0, %c0_i32 : i32, i32
  }
}

</mosaic_0001>

<bundles_post_ra>
// kernel: tpu_custom_call.1
= control target key start
LH: loop header
LB: loop body
LE: loop exit
PB: predicated region body
PF: predicated region fallthrough
CT: control target
= control target key end

     0   :  { %s535_s15 = smov 0   ;;  %s561_s0 = inlined_call_operand.vmem [shape: bf16[64,16], index: 0, kind: input, shape index: {}]   ;;  %s562_s1 = inlined_call_operand.vmem [shape: bf16[16,32], index: 1, kind: input, shape index: {}]   ;;  %s563_s2 = inlined_call_operand.vmem [shape: bf16[16,8], index: 2, kind: input, shape index: {}]   ;;  %s564_s3 = inlined_call_operand.vmem [shape: f32[64,32], index: 3, kind: output, shape index: {0}]   ;;  %s565_s4 = inlined_call_operand.vmem [shape: f32[64,8], index: 4, kind: output, shape index: {1}]  }
   0x1 LB: > { %s451_s16 = sadd.s32 4294967295, %s508_s15   ;;  %p455_p0 = scmp.ge.s32.totalorder %s508_s15, 1  ;;  %s508_s15 = sphi %s535_s15, %s15_s15  }
   0x2   : > { %p166_p1 = scmp.lt.s32.totalorder %s508_s15, 3 }
   0x4   : > { %p167_p2 = pnand %p455_p0, %p166_p1 }
   0x5   : > { %s456_s19 = sshll.u32 (!%p167_p2), %s451_s16, 2 }
   0x6   : > { %170 = sbr.rel (%p167_p2) target bundleno = 217 (0xd9), region = 32  ;;  %p198_p3 = scmp.lt.s32.totalorder (!%p167_p2), %s456_s19, 7 }
   0xb   : > { %v498_v0 = vld [vmem:[%s562_s1] sm:$0xff]   ;;  %s567_s19 = smov (!%p198_p3, %s456_s19), 7  ;;  %vm238_vm0 = vcmask 130048   ;;  %vm294_vm1 = vcmask 261120   ;;  %vm356_vm2 = vcmask 64512  }
   0xc   : > { %v499_v1 = vld [vmem:[%s563_s2] sm:$0xff]   ;;  %478 = vmatprep.subr.bf16.mxu0 %v498_v0  ;;  %s457_s22 = sshll.u32 %s567_s19, 2  ;;  %s459_s26 = sshll.u32 %s567_s19, 3 }
   0xd   : > { %484 = vmatprep.subr.bf16.mxu1 %v499_v1  ;;  %479 = vmatpush3.bf16.msra.mxu0 %v498_v0  ;;  %s201_s25 = scalar_lea.vmem %s561_s0, %s457_s22  ;;  %s207_s29 = scalar_lea.vmem %s564_s3, %s459_s26 }
   0xe   : > { %485 = vmatpush3.bf16.msra.mxu1 %v499_v1  ;;  %v500_v2 = vld [vmem:[%s201_s25] sm:$0xff]   ;;  %v501_v3 = vld [vmem:[%s201_s25 + $0x8] sm:$0xff]   ;;  %s213_s6 = scalar_lea.vmem %s565_s4, %s459_s26 }
   0xf   : > { %480 = vmatprep.mubr.msk.bf16.mxu0 %vm238_vm0, %v500_v2  ;;  %486 = vmatprep.mubr.msk.bf16.mxu1 %vm238_vm0, %v500_v2 }
  0x10   : > { %481 = vmatmul.mubr.msk.bf16.vlgmr.msra.gmra.mxu0 %vm238_vm0, %v501_v3 }
  0x11   : > { %487 = vmatmul.mubr.msk.bf16.vlgmr.msra.gmra.mxu1 %vm238_vm0, %v501_v3 }
  0xd0   : > { %v482_v4 = vpop.f32.mrf.mxu0 }
  0xd1   : > { %v488_v5 = vpop.f32.mrf.mxu1  ;;  %297 = vst.msk [vmem:[%s207_s29 + $0x10] sm:$0xff] %vm294_vm1, %v482_v4 }
  0xd2   : > { %v279_v6 = vpop.f32.mrf.mxu0  ;;  %359 = vst.msk [vmem:[%s213_s6 + $0x10] sm:$0xff] %vm356_vm2, %v488_v5 }
  0xd3   : > { %v341_v7 = vpop.f32.mrf.mxu1  ;;  %295 = vst.msk [vmem:[%s207_s29] sm:$0xff] %vm294_vm1, %v279_v6 }
  0xd4   : > { %357 = vst.msk [vmem:[%s213_s6] sm:$0xff] %vm356_vm2, %v341_v7  ;;  %v483_v8 = vpop.f32.mrf.mxu0 }
  0xd5   : > { %v489_v9 = vpop.f32.mrf.mxu1  ;;  %298 = vst.msk [vmem:[%s207_s29 + $0x18] sm:$0xff] %vm294_vm1, %v483_v8 }
  0xd6   : > { %v282_v10 = vpop.f32.mrf.mxu0  ;;  %360 = vst.msk [vmem:[%s213_s6 + $0x18] sm:$0xff] %vm356_vm2, %v489_v9 }
  0xd7   : > { %v344_v11 = vpop.f32.mrf.mxu1  ;;  %296 = vst.msk [vmem:[%s207_s29 + $0x8] sm:$0xff] %vm294_vm1, %v282_v10 }
  0xd8   : > { %358 = vst.msk [vmem:[%s213_s6 + $0x8] sm:$0xff] %vm356_vm2, %v344_v11 }
  0xd9 PF: > { %s15_s15 = sadd.s32 1, %s508_s15  }
  0xda   : > { %p12_p4 = scmp.ge.s32.totalorder %s15_s15, 4  }
  0xdc   :  { %14 = sbr.rel (!%p12_p4) target bundleno = 1 (0x1), region = 74 }

</bundles_post_ra>
